<compile_context>
chip_gen: v7x
topology: tpu7x:2x2x1
jax: 0.10.0
libtpu: 0.0.40
codegen_flags: <defaults>
</compile_context>

<pallas_src>
import jax
import jax.numpy as jnp
from jax.experimental import pallas as pl
from jax.experimental.pallas import tpu as pltpu


def _clip_loss_kernel(scalars_ref, img_ref, txt_ref, out_ref,
                      acc_ref, row_m, row_s, col_m, col_s, sums):
    i = pl.program_id(0)
    j = pl.program_id(1)
    k = pl.program_id(2)
    ni = pl.num_programs(0)
    nj = pl.num_programs(1)
    nk = pl.num_programs(2)

    @pl.when(jnp.logical_and(jnp.logical_and(i == 0, j == 0), k == 0))
    def _init_sums():
        sums[0] = 0.0   # sum of row logsumexps      (CE(L)   numerator part)
        sums[1] = 0.0   # sum of column logsumexps   (CE(L.T) numerator part)
        sums[2] = 0.0   # sum of diagonal logits     (trace(L))

    @pl.when(k == 0)
    def _init_acc():
        acc_ref[...] = jnp.zeros_like(acc_ref)

    @pl.when(jnp.logical_and(j == 0, k == 0))
    def _init_row_state():
        row_m[...] = jnp.full_like(row_m, -jnp.inf)
        row_s[...] = jnp.zeros_like(row_s)

    @pl.when(jnp.logical_and(i == 0, k == 0))
    def _init_col_state():
        col_m[j] = jnp.full(col_m.shape[1:], -jnp.inf, dtype=col_m.dtype)
        col_s[j] = jnp.zeros(col_s.shape[1:], dtype=col_s.dtype)

    # Raw (un-scaled) logits tile: native-dtype operands straight into the MXU,
    # NT form (contract last dim of both) -> no explicit transpose, f32 accumulate.
    acc_ref[...] += jax.lax.dot_general(
        img_ref[...], txt_ref[...],
        dimension_numbers=(((1,), (1,)), ((), ())),
        preferred_element_type=jnp.float32)

    @pl.when(k == nk - 1)
    def _finish_tile():
        z = acc_ref[...] * scalars_ref[0]            # [tb, tb] f32 logits tile

        # --- online logsumexp over rows (for CE(L, labels)) ---
        m_prev = row_m[...]
        m_new = jnp.maximum(m_prev, jnp.max(z, axis=1, keepdims=True))
        row_s[...] = (row_s[...] * jnp.exp(m_prev - m_new)
                      + jnp.sum(jnp.exp(z - m_new), axis=1, keepdims=True))
        row_m[...] = m_new

        # --- online logsumexp over columns (for CE(L.T, labels)) ---
        cm_prev = col_m[j]
        cm_new = jnp.maximum(cm_prev, jnp.max(z, axis=0, keepdims=True))
        col_s[j] = (col_s[j] * jnp.exp(cm_prev - cm_new)
                    + jnp.sum(jnp.exp(z - cm_new), axis=0, keepdims=True))
        col_m[j] = cm_new

        # --- label (diagonal) logits only live on i == j tiles (tb_m == tb_n) ---
        @pl.when(i == j)
        def _diag():
            r = jax.lax.broadcasted_iota(jnp.int32, z.shape, 0)
            c = jax.lax.broadcasted_iota(jnp.int32, z.shape, 1)
            sums[2] += jnp.sum(jnp.where(r == c, z, 0.0))

        # Row block i finished after the last column block.
        @pl.when(j == nj - 1)
        def _finish_row_block():
            sums[0] += jnp.sum(row_m[...] + jnp.log(row_s[...]))

        # Column block j finished after the last row block.
        @pl.when(i == ni - 1)
        def _finish_col_block():
            sums[1] += jnp.sum(col_m[j] + jnp.log(col_s[j]))

        @pl.when(jnp.logical_and(i == ni - 1, j == nj - 1))
        def _write_out():
            inv_two_b = scalars_ref[1]     # 1 / (2 * global B), precomputed
            out_ref[0, 0] = (sums[0] + sums[1] - 2.0 * sums[2]) * inv_two_b


def clip_loss(image_features, text_features, logit_scale,
              *, block_b=None, block_k=None):
    """Pallas implementation of ClipLoss.forward (single-device path).

    Returns {'contrastive_loss': scalar} matching the PyTorch module.
    """
    B, D = image_features.shape
    assert text_features.shape == (B, D)

    # Generation-aware defaults: 256-aligned logits tiles keep the v6e/v7x MXU
    # fed while staying far under v7x's 64 MiB VMEM; fall back to full extent
    # for small shapes.
    tb = block_b if block_b is not None else (256 if B % 256 == 0 else B)
    tk = block_k if block_k is not None else (512 if D % 512 == 0 else D)
    tb = min(tb, B)
    tk = min(tk, D)
    assert B % tb == 0 and D % tk == 0, "tile sizes must divide (B, D)"
    assert (tb % 8 == 0) or (tb == B), "row tile must be 8-aligned or full"
    assert (tk % 128 == 0) or (tk == D), "k tile must be 128-aligned or full"

    ni, nj, nk = B // tb, B // tb, D // tk

    # [logit_scale, 1/(2B)] -- scalar prefetch into SMEM (true global B).
    scalars = jnp.array([logit_scale, 1.0 / (2.0 * B)], dtype=jnp.float32)

    itemsize = jnp.dtype(image_features.dtype).itemsize
    cost = pl.CostEstimate(
        flops=2 * B * B * D,
        transcendentals=2 * B * B,
        bytes_accessed=(nj * B * D + ni * B * D) * itemsize + 4,
    )

    out = pl.pallas_call(
        _clip_loss_kernel,
        out_shape=jax.ShapeDtypeStruct((1, 1), jnp.float32),
        grid_spec=pltpu.PrefetchScalarGridSpec(
            num_scalar_prefetch=1,
            grid=(ni, nj, nk),
            in_specs=[
                pl.BlockSpec((tb, tk), lambda i, j, k, s: (i, k)),   # image feats
                pl.BlockSpec((tb, tk), lambda i, j, k, s: (j, k)),   # text feats
            ],
            out_specs=pl.BlockSpec((1, 1), lambda i, j, k, s: (0, 0),
                                   memory_space=pltpu.SMEM),
            scratch_shapes=[
                pltpu.VMEM((tb, tb), jnp.float32),      # logits tile accumulator
                pltpu.VMEM((tb, 1), jnp.float32),       # row running max
                pltpu.VMEM((tb, 1), jnp.float32),       # row running sum-exp
                pltpu.VMEM((nj, 1, tb), jnp.float32),   # col running max (per j)
                pltpu.VMEM((nj, 1, tb), jnp.float32),   # col running sum-exp (per j)
                pltpu.SMEM((3,), jnp.float32),          # scalar partial sums
            ],
        ),
        compiler_params=pltpu.CompilerParams(
            # Every axis carries cross-iteration state (online LSE + scalar
            # reduction into one output), so no axis can be "parallel".
            dimension_semantics=("arbitrary", "arbitrary", "arbitrary"),
        ),
        cost_estimate=cost,
    )(scalars, image_features, text_features)

    return {"contrastive_loss": out[0, 0]}


def _reference_clip_loss(image_features, text_features, logit_scale):
    # Pure-JAX reference of the PyTorch ClipLoss (single-device path).
    img = image_features.astype(jnp.float32)
    txt = text_features.astype(jnp.float32)
    logits_per_image = logit_scale * img @ txt.T
    logits_per_text = logits_per_image.T
    B = img.shape[0]
    labels = jnp.arange(B)

    def ce(logits):
        lse = jax.scipy.special.logsumexp(logits, axis=1)
        return jnp.mean(lse - logits[labels, labels])

    return 0.5 * (ce(logits_per_image) + ce(logits_per_text))


if __name__ == "__main__":
    key = jax.random.PRNGKey(0)
    B, D = 16, 256
    k1, k2 = jax.random.split(key)

    # Deterministic synthetic features (L2-normalized, as CLIP heads produce).
    img = jax.random.normal(k1, (B, D), dtype=jnp.float32)
    txt = jax.random.normal(k2, (B, D), dtype=jnp.float32)
    img = img / jnp.linalg.norm(img, axis=-1, keepdims=True)
    txt = txt / jnp.linalg.norm(txt, axis=-1, keepdims=True)

    logit_scale = 10.0   # compute_similarity temperature (exp of learned log-scale)

    # Small tiles so the test actually exercises the (i, j, k) = (2, 2, 2) grid
    # and all cross-tile accumulator paths.
    result = clip_loss(img, txt, logit_scale, block_b=8, block_k=128)
    loss = jax.block_until_ready(result["contrastive_loss"])

    ref = _reference_clip_loss(img, txt, logit_scale)
    assert jnp.allclose(loss, ref, rtol=1e-4, atol=1e-4), (loss, ref)

    print("KERNEL_OK")
</pallas_src>

<mosaic_0001>
module attributes {stable_mosaic.version = 11 : i64} {
  func.func @_clip_loss_kernel(%arg0: i32, %arg1: i32, %arg2: i32, %arg3: memref<2xf32, #tpu.memory_space<smem>>, %arg4: memref<8x128xf32, #tpu.memory_space<vmem>>, %arg5: memref<8x128xf32, #tpu.memory_space<vmem>>, %arg6: memref<1x1xf32, #tpu.memory_space<smem>>, %arg7: memref<8x8xf32, #tpu.memory_space<vmem>>, %arg8: memref<8x1xf32, #tpu.memory_space<vmem>>, %arg9: memref<8x1xf32, #tpu.memory_space<vmem>>, %arg10: memref<2x1x8xf32, #tpu.memory_space<vmem>>, %arg11: memref<2x1x8xf32, #tpu.memory_space<vmem>>, %arg12: memref<3xf32, #tpu.memory_space<smem>>) attributes {dimension_semantics = [#tpu.dimension_semantics<arbitrary>, #tpu.dimension_semantics<arbitrary>, #tpu.dimension_semantics<arbitrary>], iteration_bounds = array<i64: 2, 2, 2>, scalar_prefetch = 1 : i64, scratch_operands = 6 : i64, tpu.core_type = #tpu.core_type<tc>, window_params = [{transform_indices = @transform_0, window_bounds = array<i64: 8, 128>}, {transform_indices = @transform_1, window_bounds = array<i64: 8, 128>}, {transform_indices = @transform_2, window_bounds = array<i64: 1, 1>}]} {
    %c0_i32 = arith.constant 0 : i32
    %0 = arith.cmpi eq, %arg0, %c0_i32 : i32
    %c0_i32_0 = arith.constant 0 : i32
    %1 = arith.cmpi eq, %arg1, %c0_i32_0 : i32
    %2 = arith.andi %0, %1 : i1
    %c0_i32_1 = arith.constant 0 : i32
    %3 = arith.cmpi eq, %arg2, %c0_i32_1 : i32
    %4 = arith.andi %2, %3 : i1
    %5 = arith.extui %4 : i1 to i32
    %c0_i32_2 = arith.constant 0 : i32
    %6 = arith.cmpi ne, %5, %c0_i32_2 : i32
    scf.if %6 {
      %cst_19 = arith.constant 0.000000e+00 : f32
      %c0_20 = arith.constant 0 : index
      %29 = memref.load %arg12[%c0_20] : memref<3xf32, #tpu.memory_space<smem>>
      memref.store %cst_19, %arg12[%c0_20] : memref<3xf32, #tpu.memory_space<smem>>
      %cst_21 = arith.constant 0.000000e+00 : f32
      %c1 = arith.constant 1 : index
      %30 = memref.load %arg12[%c1] : memref<3xf32, #tpu.memory_space<smem>>
      memref.store %cst_21, %arg12[%c1] : memref<3xf32, #tpu.memory_space<smem>>
      %cst_22 = arith.constant 0.000000e+00 : f32
      %c2 = arith.constant 2 : index
      %31 = memref.load %arg12[%c2] : memref<3xf32, #tpu.memory_space<smem>>
      memref.store %cst_22, %arg12[%c2] : memref<3xf32, #tpu.memory_space<smem>>
    } else {
    }
    %c0_i32_3 = arith.constant 0 : i32
    %7 = arith.cmpi eq, %arg2, %c0_i32_3 : i32
    %8 = arith.extui %7 : i1 to i32
    %c0_i32_4 = arith.constant 0 : i32
    %9 = arith.cmpi ne, %8, %c0_i32_4 : i32
    scf.if %9 {
      %cst_19 = arith.constant 0.000000e+00 : f32
      %29 = vector.broadcast %cst_19 : f32 to vector<8x8xf32>
      %c0_20 = arith.constant 0 : index
      %c0_21 = arith.constant 0 : index
      %30 = vector.load %arg7[%c0_20, %c0_21] : memref<8x8xf32, #tpu.memory_space<vmem>>, vector<8x8xf32>
      tpu.vector_store %arg7[%c0_20, %c0_21], %29 {strides = array<i32>} : memref<8x8xf32, #tpu.memory_space<vmem>>, vector<8x8xf32>,
    } else {
    }
    %c0_i32_5 = arith.constant 0 : i32
    %10 = arith.cmpi eq, %arg1, %c0_i32_5 : i32
    %c0_i32_6 = arith.constant 0 : i32
    %11 = arith.cmpi eq, %arg2, %c0_i32_6 : i32
    %12 = arith.andi %10, %11 : i1
    %13 = arith.extui %12 : i1 to i32
    %c0_i32_7 = arith.constant 0 : i32
    %14 = arith.cmpi ne, %13, %c0_i32_7 : i32
    scf.if %14 {
      %cst_19 = arith.constant 0xFF800000 : f32
      %29 = vector.broadcast %cst_19 : f32 to vector<8x1xf32>
      %c0_20 = arith.constant 0 : index
      %c0_21 = arith.constant 0 : index
      %30 = vector.load %arg8[%c0_20, %c0_21] : memref<8x1xf32, #tpu.memory_space<vmem>>, vector<8x1xf32>
      tpu.vector_store %arg8[%c0_20, %c0_21], %29 {strides = array<i32>} : memref<8x1xf32, #tpu.memory_space<vmem>>, vector<8x1xf32>,
      %cst_22 = arith.constant 0.000000e+00 : f32
      %31 = vector.broadcast %cst_22 : f32 to vector<8x1xf32>
      %c0_23 = arith.constant 0 : index
      %c0_24 = arith.constant 0 : index
      %32 = vector.load %arg9[%c0_23, %c0_24] : memref<8x1xf32, #tpu.memory_space<vmem>>, vector<8x1xf32>
      tpu.vector_store %arg9[%c0_23, %c0_24], %31 {strides = array<i32>} : memref<8x1xf32, #tpu.memory_space<vmem>>, vector<8x1xf32>,
    } else {
    }
    %c0_i32_8 = arith.constant 0 : i32
    %15 = arith.cmpi eq, %arg0, %c0_i32_8 : i32
    %c0_i32_9 = arith.constant 0 : i32
    %16 = arith.cmpi eq, %arg2, %c0_i32_9 : i32
    %17 = arith.andi %15, %16 : i1
    %18 = arith.extui %17 : i1 to i32
    %c0_i32_10 = arith.constant 0 : i32
    %19 = arith.cmpi ne, %18, %c0_i32_10 : i32
    scf.if %19 {
      %cst_19 = arith.constant 0xFF800000 : f32
      %29 = vector.broadcast %cst_19 : f32 to vector<1x8xf32>
      %30 = arith.index_cast %arg1 : i32 to index
      %c0_20 = arith.constant 0 : index
      %c0_21 = arith.constant 0 : index
      %31 = vector.load %arg10[%30, %c0_20, %c0_21] : memref<2x1x8xf32, #tpu.memory_space<vmem>>, vector<1x1x8xf32>
      %32 = vector.shape_cast %31 : vector<1x1x8xf32> to vector<1x8xf32>
      %33 = vector.shape_cast %29 : vector<1x8xf32> to vector<1x1x8xf32>
      tpu.vector_store %arg10[%30, %c0_20, %c0_21], %33 {strides = array<i32>} : memref<2x1x8xf32, #tpu.memory_space<vmem>>, vector<1x1x8xf32>,
      %cst_22 = arith.constant 0.000000e+00 : f32
      %34 = vector.broadcast %cst_22 : f32 to vector<1x8xf32>
      %35 = arith.index_cast %arg1 : i32 to index
      %c0_23 = arith.constant 0 : index
      %c0_24 = arith.constant 0 : index
      %36 = vector.load %arg11[%35, %c0_23, %c0_24] : memref<2x1x8xf32, #tpu.memory_space<vmem>>, vector<1x1x8xf32>
      %37 = vector.shape_cast %36 : vector<1x1x8xf32> to vector<1x8xf32>
      %38 = vector.shape_cast %34 : vector<1x8xf32> to vector<1x1x8xf32>
      tpu.vector_store %arg11[%35, %c0_23, %c0_24], %38 {strides = array<i32>} : memref<2x1x8xf32, #tpu.memory_space<vmem>>, vector<1x1x8xf32>,
    } else {
    }
    %c0 = arith.constant 0 : index
    %c0_11 = arith.constant 0 : index
    %20 = vector.load %arg7[%c0, %c0_11] : memref<8x8xf32, #tpu.memory_space<vmem>>, vector<8x8xf32>
    %c0_12 = arith.constant 0 : index
    %c0_13 = arith.constant 0 : index
    %21 = vector.load %arg4[%c0_12, %c0_13] : memref<8x128xf32, #tpu.memory_space<vmem>>, vector<8x128xf32>
    %c0_14 = arith.constant 0 : index
    %c0_15 = arith.constant 0 : index
    %22 = vector.load %arg5[%c0_14, %c0_15] : memref<8x128xf32, #tpu.memory_space<vmem>>, vector<8x128xf32>
    %cst = arith.constant dense<0.000000e+00> : vector<8x8xf32>
    %23 = tpu.matmul %21, %22, %cst {dimension_numbers = #tpu.dot_dimension_numbers<[1], [1], [0], [0], [0, 0, 1, 0], [], []>} : vector<8x128xf32>, vector<8x128xf32>, vector<8x8xf32> -> vector<8x8xf32>
    %24 = arith.addf %20, %23 : vector<8x8xf32>
    %c0_16 = arith.constant 0 : index
    %c0_17 = arith.constant 0 : index
    %25 = vector.load %arg7[%c0_16, %c0_17] : memref<8x8xf32, #tpu.memory_space<vmem>>, vector<8x8xf32>
    tpu.vector_store %arg7[%c0_16, %c0_17], %24 {strides = array<i32>} : memref<8x8xf32, #tpu.memory_space<vmem>>, vector<8x8xf32>,
    %c1_i32 = arith.constant 1 : i32
    %26 = arith.cmpi eq, %arg2, %c1_i32 : i32
    %27 = arith.extui %26 : i1 to i32
    %c0_i32_18 = arith.constant 0 : i32
    %28 = arith.cmpi ne, %27, %c0_i32_18 : i32
    scf.if %28 {
      %c0_19 = arith.constant 0 : index
      %c0_20 = arith.constant 0 : index
      %29 = vector.load %arg7[%c0_19, %c0_20] : memref<8x8xf32, #tpu.memory_space<vmem>>, vector<8x8xf32>
      %c0_21 = arith.constant 0 : index
      %30 = memref.load %arg3[%c0_21] : memref<2xf32, #tpu.memory_space<smem>>
      %31 = vector.broadcast %30 : f32 to vector<8x8xf32>
      %32 = arith.mulf %29, %31 : vector<8x8xf32>
      %c0_22 = arith.constant 0 : index
      %c0_23 = arith.constant 0 : index
      %33 = vector.load %arg8[%c0_22, %c0_23] : memref<8x1xf32, #tpu.memory_space<vmem>>, vector<8x1xf32>
      %cst_24 = arith.constant dense<0xFF800000> : vector<8xf32>
      %34 = vector.multi_reduction <maximumf>, %32, %cst_24 [1] : vector<8x8xf32> to vector<8xf32>
      %35 = vector.shape_cast %34 : vector<8xf32> to vector<8x1xf32>
      %36 = arith.maximumf %33, %35 : vector<8x1xf32>
      %c0_25 = arith.constant 0 : index
      %c0_26 = arith.constant 0 : index
      %37 = vector.load %arg9[%c0_25, %c0_26] : memref<8x1xf32, #tpu.memory_space<vmem>>, vector<8x1xf32>
      %38 = arith.subf %33, %36 : vector<8x1xf32>
      %39 = math.exp %38 : vector<8x1xf32>
      %40 = arith.mulf %37, %39 : vector<8x1xf32>
      %41 = vector.broadcast %36 : vector<8x1xf32> to vector<8x8xf32>
      %42 = arith.subf %32, %41 : vector<8x8xf32>
      %43 = math.exp %42 : vector<8x8xf32>
      %cst_27 = arith.constant dense<0.000000e+00> : vector<8xf32>
      %44 = vector.multi_reduction <add>, %43, %cst_27 [1] : vector<8x8xf32> to vector<8xf32>
      %45 = vector.shape_cast %44 : vector<8xf32> to vector<8x1xf32>
      %46 = arith.addf %40, %45 : vector<8x1xf32>
      %c0_28 = arith.constant 0 : index
      %c0_29 = arith.constant 0 : index
      %47 = vector.load %arg9[%c0_28, %c0_29] : memref<8x1xf32, #tpu.memory_space<vmem>>, vector<8x1xf32>
      tpu.vector_store %arg9[%c0_28, %c0_29], %46 {strides = array<i32>} : memref<8x1xf32, #tpu.memory_space<vmem>>, vector<8x1xf32>,
      %c0_30 = arith.constant 0 : index
      %c0_31 = arith.constant 0 : index
      %48 = vector.load %arg8[%c0_30, %c0_31] : memref<8x1xf32, #tpu.memory_space<vmem>>, vector<8x1xf32>
      tpu.vector_store %arg8[%c0_30, %c0_31], %36 {strides = array<i32>} : memref<8x1xf32, #tpu.memory_space<vmem>>, vector<8x1xf32>,
      %49 = arith.index_cast %arg1 : i32 to index
      %c0_32 = arith.constant 0 : index
      %c0_33 = arith.constant 0 : index
      %50 = vector.load %arg10[%49, %c0_32, %c0_33] : memref<2x1x8xf32, #tpu.memory_space<vmem>>, vector<1x1x8xf32>
      %51 = vector.shape_cast %50 : vector<1x1x8xf32> to vector<1x8xf32>
      %cst_34 = arith.constant dense<0xFF800000> : vector<8xf32>
      %52 = vector.multi_reduction <maximumf>, %32, %cst_34 [0] : vector<8x8xf32> to vector<8xf32>
      %53 = vector.shape_cast %52 : vector<8xf32> to vector<1x8xf32>
      %54 = arith.maximumf %51, %53 : vector<1x8xf32>
      %55 = arith.index_cast %arg1 : i32 to index
      %c0_35 = arith.constant 0 : index
      %c0_36 = arith.constant 0 : index
      %56 = vector.load %arg11[%55, %c0_35, %c0_36] : memref<2x1x8xf32, #tpu.memory_space<vmem>>, vector<1x1x8xf32>
      %57 = vector.shape_cast %56 : vector<1x1x8xf32> to vector<1x8xf32>
      %58 = arith.subf %51, %54 : vector<1x8xf32>
      %59 = math.exp %58 : vector<1x8xf32>
      %60 = arith.mulf %57, %59 : vector<1x8xf32>
      %61 = vector.broadcast %54 : vector<1x8xf32> to vector<8x8xf32>
      %62 = arith.subf %32, %61 : vector<8x8xf32>
      %63 = math.exp %62 : vector<8x8xf32>
      %cst_37 = arith.constant dense<0.000000e+00> : vector<8xf32>
      %64 = vector.multi_reduction <add>, %63, %cst_37 [0] : vector<8x8xf32> to vector<8xf32>
      %65 = vector.shape_cast %64 : vector<8xf32> to vector<1x8xf32>
      %66 = arith.addf %60, %65 : vector<1x8xf32>
      %67 = arith.index_cast %arg1 : i32 to index
      %c0_38 = arith.constant 0 : index
      %c0_39 = arith.constant 0 : index
      %68 = vector.load %arg11[%67, %c0_38, %c0_39] : memref<2x1x8xf32, #tpu.memory_space<vmem>>, vector<1x1x8xf32>
      %69 = vector.shape_cast %68 : vector<1x1x8xf32> to vector<1x8xf32>
      %70 = vector.shape_cast %66 : vector<1x8xf32> to vector<1x1x8xf32>
      tpu.vector_store %arg11[%67, %c0_38, %c0_39], %70 {strides = array<i32>} : memref<2x1x8xf32, #tpu.memory_space<vmem>>, vector<1x1x8xf32>,
      %71 = arith.index_cast %arg1 : i32 to index
      %c0_40 = arith.constant 0 : index
      %c0_41 = arith.constant 0 : index
      %72 = vector.load %arg10[%71, %c0_40, %c0_41] : memref<2x1x8xf32, #tpu.memory_space<vmem>>, vector<1x1x8xf32>
      %73 = vector.shape_cast %72 : vector<1x1x8xf32> to vector<1x8xf32>
      %74 = vector.shape_cast %54 : vector<1x8xf32> to vector<1x1x8xf32>
      tpu.vector_store %arg10[%71, %c0_40, %c0_41], %74 {strides = array<i32>} : memref<2x1x8xf32, #tpu.memory_space<vmem>>, vector<1x1x8xf32>,
      %75 = arith.cmpi eq, %arg0, %arg1 : i32
      %76 = arith.extui %75 : i1 to i32
      %c0_i32_42 = arith.constant 0 : i32
      %77 = arith.cmpi ne, %76, %c0_i32_42 : i32
      scf.if %77 {
        %89 = tpu.iota {dimensions = array<i32: 0>} : vector<8x8xi32>
        %90 = tpu.iota {dimensions = array<i32: 1>} : vector<8x8xi32>
        %c2 = arith.constant 2 : index
        %91 = memref.load %arg12[%c2] : memref<3xf32, #tpu.memory_space<smem>>
        %92 = arith.cmpi eq, %89, %90 : vector<8x8xi32>
        %cst_50 = arith.constant 0.000000e+00 : f32
        %93 = vector.broadcast %cst_50 : f32 to vector<8x8xf32>
        %94 = arith.select %92, %32, %93 : vector<8x8xi1>, vector<8x8xf32>
        %95 = vector.shape_cast %94 : vector<8x8xf32> to vector<1x8x8xf32>
        %cst_51 = arith.constant dense<0.000000e+00> : vector<1xf32>
        %96 = vector.multi_reduction <add>, %95, %cst_51 [1, 2] : vector<1x8x8xf32> to vector<1xf32>
        %97 = vector.shape_cast %96 : vector<1xf32> to vector<1x1x1xf32>
        %98 = vector.extract %97[0, 0, 0] : f32 from vector<1x1x1xf32>
        %99 = arith.addf %91, %98 : f32
        %c2_52 = arith.constant 2 : index
        %100 = memref.load %arg12[%c2_52] : memref<3xf32, #tpu.memory_space<smem>>
        memref.store %99, %arg12[%c2_52] : memref<3xf32, #tpu.memory_space<smem>>
      } else {
      }
      %c1_i32_43 = arith.constant 1 : i32
      %78 = arith.cmpi eq, %arg1, %c1_i32_43 : i32
      %79 = arith.extui %78 : i1 to i32
      %c0_i32_44 = arith.constant 0 : i32
      %80 = arith.cmpi ne, %79, %c0_i32_44 : i32
      scf.if %80 {
        %c0_50 = arith.constant 0 : index
        %89 = memref.load %arg12[%c0_50] : memref<3xf32, #tpu.memory_space<smem>>
        %c0_51 = arith.constant 0 : index
        %c0_52 = arith.constant 0 : index
        %90 = vector.load %arg8[%c0_51, %c0_52] : memref<8x1xf32, #tpu.memory_space<vmem>>, vector<8x1xf32>
        %c0_53 = arith.constant 0 : index
        %c0_54 = arith.constant 0 : index
        %91 = vector.load %arg9[%c0_53, %c0_54] : memref<8x1xf32, #tpu.memory_space<vmem>>, vector<8x1xf32>
        %92 = math.log %91 : vector<8x1xf32>
        %93 = arith.addf %90, %92 : vector<8x1xf32>
        %94 = vector.shape_cast %93 : vector<8x1xf32> to vector<1x8x1xf32>
        %cst_55 = arith.constant dense<0.000000e+00> : vector<1xf32>
        %95 = vector.multi_reduction <add>, %94, %cst_55 [1, 2] : vector<1x8x1xf32> to vector<1xf32>
        %96 = vector.shape_cast %95 : vector<1xf32> to vector<1x1x1xf32>
        %97 = vector.extract %96[0, 0, 0] : f32 from vector<1x1x1xf32>
        %98 = arith.addf %89, %97 : f32
        %c0_56 = arith.constant 0 : index
        %99 = memref.load %arg12[%c0_56] : memref<3xf32, #tpu.memory_space<smem>>
        memref.store %98, %arg12[%c0_56] : memref<3xf32, #tpu.memory_space<smem>>
      } else {
      }
      %c1_i32_45 = arith.constant 1 : i32
      %81 = arith.cmpi eq, %arg0, %c1_i32_45 : i32
      %82 = arith.extui %81 : i1 to i32
      %c0_i32_46 = arith.constant 0 : i32
      %83 = arith.cmpi ne, %82, %c0_i32_46 : i32
      scf.if %83 {
        %c1 = arith.constant 1 : index
        %89 = memref.load %arg12[%c1] : memref<3xf32, #tpu.memory_space<smem>>
        %90 = arith.index_cast %arg1 : i32 to index
        %c0_50 = arith.constant 0 : index
        %c0_51 = arith.constant 0 : index
        %91 = vector.load %arg10[%90, %c0_50, %c0_51] : memref<2x1x8xf32, #tpu.memory_space<vmem>>, vector<1x1x8xf32>
        %92 = vector.shape_cast %91 : vector<1x1x8xf32> to vector<1x8xf32>
        %93 = arith.index_cast %arg1 : i32 to index
        %c0_52 = arith.constant 0 : index
        %c0_53 = arith.constant 0 : index
        %94 = vector.load %arg11[%93, %c0_52, %c0_53] : memref<2x1x8xf32, #tpu.memory_space<vmem>>, vector<1x1x8xf32>
        %95 = vector.shape_cast %94 : vector<1x1x8xf32> to vector<1x8xf32>
        %96 = math.log %95 : vector<1x8xf32>
        %97 = arith.addf %92, %96 : vector<1x8xf32>
        %98 = vector.shape_cast %97 : vector<1x8xf32> to vector<1x1x8xf32>
        %cst_54 = arith.constant dense<0.000000e+00> : vector<1xf32>
        %99 = vector.multi_reduction <add>, %98, %cst_54 [1, 2] : vector<1x1x8xf32> to vector<1xf32>
        %100 = vector.shape_cast %99 : vector<1xf32> to vector<1x1x1xf32>
        %101 = vector.extract %100[0, 0, 0] : f32 from vector<1x1x1xf32>
        %102 = arith.addf %89, %101 : f32
        %c1_55 = arith.constant 1 : index
        %103 = memref.load %arg12[%c1_55] : memref<3xf32, #tpu.memory_space<smem>>
        memref.store %102, %arg12[%c1_55] : memref<3xf32, #tpu.memory_space<smem>>
      } else {
      }
      %c1_i32_47 = arith.constant 1 : i32
      %84 = arith.cmpi eq, %arg0, %c1_i32_47 : i32
      %c1_i32_48 = arith.constant 1 : i32
      %85 = arith.cmpi eq, %arg1, %c1_i32_48 : i32
      %86 = arith.andi %84, %85 : i1
      %87 = arith.extui %86 : i1 to i32
      %c0_i32_49 = arith.constant 0 : i32
      %88 = arith.cmpi ne, %87, %c0_i32_49 : i32
      scf.if %88 {
        %c1 = arith.constant 1 : index
        %89 = memref.load %arg3[%c1] : memref<2xf32, #tpu.memory_space<smem>>
        %c0_50 = arith.constant 0 : index
        %90 = memref.load %arg12[%c0_50] : memref<3xf32, #tpu.memory_space<smem>>
        %c1_51 = arith.constant 1 : index
        %91 = memref.load %arg12[%c1_51] : memref<3xf32, #tpu.memory_space<smem>>
        %92 = arith.addf %90, %91 : f32
        %c2 = arith.constant 2 : index
        %93 = memref.load %arg12[%c2] : memref<3xf32, #tpu.memory_space<smem>>
        %cst_52 = arith.constant 2.000000e+00 : f32
        %94 = arith.mulf %cst_52, %93 : f32
        %95 = arith.subf %92, %94 : f32
        %96 = arith.mulf %95, %89 : f32
        %c0_53 = arith.constant 0 : index
        %c0_54 = arith.constant 0 : index
        %97 = memref.load %arg6[%c0_53, %c0_54] : memref<1x1xf32, #tpu.memory_space<smem>>
        memref.store %96, %arg6[%c0_53, %c0_54] : memref<1x1xf32, #tpu.memory_space<smem>>
      } else {
      }
    } else {
    }
    return
  }
  func.func @transform_0(%arg0: i32, %arg1: i32, %arg2: i32, %arg3: memref<2xf32, #tpu.memory_space<smem>>) -> (i32, i32) {
    %c0_i32 = arith.constant 0 : i32
    return %arg0, %arg2 : i32, i32
  }
  func.func @transform_1(%arg0: i32, %arg1: i32, %arg2: i32, %arg3: memref<2xf32, #tpu.memory_space<smem>>) -> (i32, i32) {
    %c0_i32 = arith.constant 0 : i32
    return %arg1, %arg2 : i32, i32
  }
  func.func @transform_2(%arg0: i32, %arg1: i32, %arg2: i32, %arg3: memref<2xf32, #tpu.memory_space<smem>>) -> (i32, i32) {
    %c0_i32 = arith.constant 0 : i32
    %c0_i32_0 = arith.constant 0 : i32
    %c0_i32_1 = arith.constant 0 : i32
    return %c0_i32, %c0_i32_0 : i32, i32
  }
}

</mosaic_0001>

<bundles_post_ra>
// kernel: tpu_custom_call.1
= control target key start
LH: loop header
LB: loop body
LE: loop exit
PB: predicated region body
PF: predicated region fallthrough
CT: control target
= control target key end

     0   :  { %s1396_s0 = inlined_call_operand.hbm [shape: f32[2], index: 0, kind: input, shape index: {}]   ;;  %s1397_s1 = inlined_call_operand.hbm [shape: f32[16,256], index: 1, kind: input, shape index: {}]   ;;  %s1398_s2 = inlined_call_operand.hbm [shape: f32[16,256], index: 2, kind: input, shape index: {}]   ;;  %s1399_s3 = inlined_call_operand.hbm [shape: f32[1,1], index: 3, kind: output, shape index: {}]  }
   0x1   :  { %1416 = sst [smem:[#allocation25_spill]] %s1397_s1  ;;  %s776_s14 = scalar_lea.hbm %s1396_s0, 16 }
   0x2   :  { %1417 = sst [smem:[#allocation26_spill]] %s1399_s3  ;;  %p777_p0 = scmp.ne.s32.totalorder %s1396_s0, %s776_s14 }
   0x3   :  { %p780_p1 = scmp.lt.u32.totalorder %s776_s14, %s1396_s0 }
   0x5   :  { %p782_p2 = pnand %p780_p1, %p777_p0 }
   0x7   :  { %785 = shalt.err (!%p782_p2)  }
   0x8   :  { %s976_s19 = smov [#allocation9]  }
   0x9   :  { %9 = dma.hbm_to_smem %s1396_s0, 16, %s976_s19, [#allocation8] }
   0xa   :  { %910 = dma.done.wait [#allocation8], 16 }
   0xb   :  { %911 = vsyncadd [#allocation8], 4294967280 }
   0xc   :  { %11 = sfence }
   0xd   :  { %12 = vsyncpa [#allocation11], 0 }
   0xe   :  { %14 = vsyncpa [#allocation11 + $0x1], 0 }
   0xf   :  { %15 = vsyncpa [#allocation14], 0 }
  0x10   :  { %17 = vsyncpa [#allocation14 + $0x1], 0 }
  0x11   :  { %18 = vsyncpa [#allocation12], 0  ;;  %s1021_s22 = smov 0   ;;  %s1023_s23 = smov 0  }
  0x12   :  { %s1025_s24 = smov 0   ;;  %s1027_s25 = smov 0  }
  0x13   :  { %s1029_s26 = smov 0   ;;  %s1031_s27 = smov 0  }
  0x14   :  { %s1033_s0 = smov 0   ;;  %s1035_s28 = smov 0  }
  0x15   :  { %s1037_s29 = smov 0   ;;  %s1039_s30 = smov 0  }
  0x16   :  { %s1041_s4 = smov 0   ;;  %s1043_s5 = smov 0  }
  0x17   :  { %s1045_s6 = smov 0  }
  0x18 LB: > { %1418 = sst [smem:[#allocation20_spill]] %s950_s0  ;;  %s1400_s7 = sadd.s32 4294967295, %s974_s6   ;;  %s974_s6 = sphi %s1045_s6, %s24_s6   ;;  %s970_s5 = sphi %s1043_s5, %s1472_s5   ;;  %s966_s4 = sphi %s1041_s4, %s1471_s4   ;;  %s962_s30 = sphi %s1039_s30, %s1470_s30   ;;  %s958_s29 = sphi %s1037_s29, %s1469_s29   ;;  %s954_s28 = sphi %s1035_s28, %s1468_s28   ;;  %s950_s0 = sphi %s1033_s0, %s1467_s0   ;;  %s946_s27 = sphi %s1031_s27, %s1466_s27   ;;  %s942_s26 = sphi %s1029_s26, %s1465_s26   ;;  %s938_s25 = sphi %s1027_s25, %s1464_s25   ;;  %s934_s24 = sphi %s1025_s24, %s1463_s24   ;;  %s930_s23 = sphi %s1023_s23, %s1462_s23   ;;  %s926_s22 = sphi %s1021_s22, %s1461_s22  }
  0x19   : > { %1419 = sst [smem:[#allocation21_spill]] %s954_s28  ;;  %s36_s8 = sadd.s32 1, %s962_s30 }
  0x1a   : > { %1420 = sst [smem:[#allocation22_spill]] %s958_s29  ;;  %p1086_p3 = scmp.ge.s32.totalorder %s36_s8, 2 }
  0x1b   : > { %p59_p4 = scmp.ne.s32.totalorder %s946_s27, %s942_s26  ;;  %p1402_p5 = scmp.eq.s32.totalorder %s974_s6, 0 }
  0x1c   : > { %s1474_s8 = smov (%p1086_p3, %s36_s8), 0  ;;  %p65_p6 = scmp.ne.s32.totalorder %s942_s26, %s938_s25 }
  0x1d   : > { %1422 = sst [smem:[#allocation23_spill]] %s1474_s8  ;;  %s1102_s12 = ssub.s32 %s962_s30, %s1474_s8 }
  0x1e   : > { %p1106_p7 = scmp.eq.s32.totalorder %s1400_s7, 0  ;;  %p61_p8 = por %p1402_p5, %p59_p4 }
  0x1f   : > { %p1401_p10 = scmp.lt.s32.totalorder %s974_s6, 8  ;;  %s138_s15 = sand.u32 1, %s946_s27  }
  0x20   : > { %s1423_s13 = scalar_select %p1106_p7, 1, 0 }
  0x21   : > { %p1114_p9 = por %p1106_p7, %p65_p6  ;;  %s589_s16 = sshll.u32 %s970_s5, 1 }
  0x22   : > { %s588_s17 = sshll.u32 %s138_s15, 3  ;;  %s147_s18 = sadd.s32 %s962_s30, %s589_s16 }
  0x23   : > { %s1424_s14 = scalar_select %p1114_p9, 1, 0 }
  0x24   : > { %s590_s19 = sshll.u32 %s147_s18, 7  ;;  %s142_s20 = scalar_lea.vmem [#allocation10], %s588_s17 }
  0x25   : > { %s151_s21 = sshll.u32 %s142_s20, 4  ;;  %s1425_s1 = sld [smem:[#allocation25_spill]]  ;;  %s1127_s21 = int_to_ptr.vmem [resolvable:$true] %s151_s21 }
  0x26   : > { %p1131_p11 = pnand %p1401_p10, %p61_p8  ;;  %s139_s16 = scalar_lea.sflag [#allocation11], %s138_s15 }
  0x28   : > { %p788_p1 = pneg %p1131_p11 }
  0x2b   : > { %s1125_s11 = scalar_lea.hbm %s1425_s1, %s590_s19  ;;  %s791_s19 = scalar_lea.hbm %s1425_s1, 512 }
  0x2c   : > { %s786_s17 = scalar_lea.hbm %s1125_s11, 128  ;;  %p792_p6 = scmp.lt.u32.totalorder %s1125_s11, %s1425_s1 }
  0x2d   : > { %p787_p0 = scmp.ne.s32.totalorder %s1125_s11, %s786_s17  ;;  %p793_p8 = scmp.lt.u32.totalorder %s791_s19, %s786_s17 }
  0x2e   : > { %p795_p5 = scmp.lt.u32.totalorder %s786_s17, %s1125_s11 }
  0x2f   : > { %p789_p2 = pnand %p788_p1, %p787_p0  ;;  %p794_p10 = por %p793_p8, %p792_p6 }
  0x31   : > { %p790_p4 = pneg %p789_p2  ;;  %p796_p12 = por %p795_p5, %p794_p10 }
  0x33   : > { %p797_p13 = pnand %p796_p12, %p790_p4 }
  0x35   : > { %800 = shalt.err (!%p797_p13)
}
  0x36   : > { %s801_s15 = scalar_lea.vmem %s1127_s21, 128  ;;  %s977_s7 = smov [#allocation10]  }
  0x37   : > { %p802_p0 = scmp.ne.s32.totalorder %s1127_s21, %s801_s15  ;;  %s806_s18 = sshll.u32 %s977_s7, 4  ;;  %s807_s18 = int_to_ptr.vmem [resolvable:$false] %s806_s18 }
  0x38   : > { %s808_s20 = scalar_lea.vmem %s807_s18, 256  ;;  %p809_p7 = scmp.lt.s32.totalorder %s1127_s21, %s807_s18 }
  0x39   : > { %p804_p2 = pnand %p802_p0, %p788_p1  ;;  %p810_p6 = scmp.lt.s32.totalorder %s808_s20, %s801_s15 }
  0x3b   : > { %p805_p9 = pneg %p804_p2  ;;  %p811_p8 = por %p810_p6, %p809_p7 }
  0x3d   : > { %p812_p5 = pnand %p811_p8, %p805_p9 }
  0x3f   : > { %815 = shalt.err (!%p812_p5)
}
  0x40   : > { %641 = dma.hbm_to_vmem [thread:$0]  (!%p1131_p11), %s1125_s11, 128, %s1127_s21, %s139_s16  }
  0x41   : > { %p1427_p7 = scmp.lt.s32.totalorder %s974_s6, 9  ;;  %p1428_p9 = scmp.ge.s32.totalorder %s974_s6, 1 }
  0x42   : > { %s39_s17 = sadd.s32 1, %s966_s4  ;;  %s80_s19 = sadd.s32 1, %s934_s24 }
  0x43   : > { %p1166_p10 = pnand %p1428_p9, %p1427_p7  ;;  %s1476_s17 = smov (!%p1086_p3, %s39_s17), %s966_s4 }
  0x44   : > { %p87_p12 = scmp.ne.s32.totalorder %s934_s24, %s930_s23  ;;  %p41_p13 = scmp.ge.s32.totalorder %s1476_s17, 2 }
  0x45   : > { %p93_p1 = scmp.ne.s32.totalorder %s930_s23, %s926_s22  ;;  %p1430_p4 = scmp.eq.s32.totalorder %s974_s6, 0 }
  0x46   : > { %s158_s21 = sand.u32 1, %s934_s24   ;;  %s1478_s17 = smov (%p41_p13, %s1476_s17), 0 }
  0x47   : > { %p1181_p0 = por %p87_p12, %p1430_p4  ;;  %1432 = sst [smem:[#allocation24_spill]] %s1478_s17 }
  0x48   : > { %s1433_s16 = sadd.s32 1, %s970_s5  ;;  %s75_s9 = ssub.s32 %s966_s4, %s1478_s17 }
  0x49   : > { %s1480_s16 = smov (!%p41_p13, %s1433_s16), %s970_s5  ;;  %p1434_p3 = scmp.ne.s32.totalorder %s1423_s13, 0 }
  0x4a   : > { %p45_p2 = scmp.ge.s32.totalorder %s1480_s16, 2  ;;  %s77_s22 = sor.u32 %s75_s9, %s1102_s12 }
  0x4b   : > { %p1195_p11 = por %p93_p1, %p1434_p3  ;;  %p78_p6 = scmp.eq.s32.totalorder %s77_s22, 0 }
  0x4c   : > { %s1482_s16 = smov (%p45_p2, %s1480_s16), 0  ;;  %s591_s18 = sshll.u32 %s158_s21, 3 }
  0x4d   : > { %s1435_s25 = scalar_select %p1195_p11, 1, 0 }
  0x4e   : > { %s1203_s15 = scalar_select %p78_p6, %s934_s24, %s80_s19  }
  0x4f   : > { %s47_s7 = ssub.s32 %s970_s5, %s1482_s16  ;;  %s592_s1 = sshll.u32 %s966_s4, 1 }
  0x50   : > { %s49_s20 = sor.u32 %s1102_s12, %s47_s7  ;;  %s167_s13 = sadd.s32 %s962_s30, %s592_s1 }
  0x51   : > { %p50_p8 = scmp.eq.s32.totalorder %s49_s20, 0  ;;  %s162_s17 = scalar_lea.vmem [#allocation13], %s591_s18 }
  0x52   : > { %s171_s8 = sshll.u32 %s162_s17, 4  ;;  %s1436_s3 = sadd.s32 1, %s946_s27  ;;  %s1215_s8 = int_to_ptr.vmem [resolvable:$true] %s171_s8 }
  0x53   : > { %s1213_s0 = scalar_select %p50_p8, %s946_s27, %s1436_s3  }
  0x54   : > { %s593_s9 = sshll.u32 %s167_s13, 7  ;;  %p1437_p5 = scmp.lt.s32.totalorder %s974_s6, 8 }
  0x55   : > { %s1220_s29 = scalar_lea.hbm %s1398_s2, %s593_s9  ;;  %s159_s3 = scalar_lea.sflag [#allocation14], %s158_s21 }
  0x56   : > { %p1226_p7 = pnand %p1437_p5, %p1181_p0  ;;  %s816_s12 = scalar_lea.hbm %s1220_s29, 128 }
  0x57   : > { %p817_p9 = scmp.ne.s32.totalorder %s1220_s29, %s816_s12  ;;  %s821_s19 = scalar_lea.hbm %s1398_s2, 512 }
  0x58   : > { %p818_p12 = pneg %p1226_p7  ;;  %p822_p4 = scmp.lt.u32.totalorder %s1220_s29, %s1398_s2 }
  0x59   : > { %p823_p0 = scmp.lt.u32.totalorder %s821_s19, %s816_s12  ;;  %p825_p2 = scmp.lt.u32.totalorder %s816_s12, %s1220_s29 }
  0x5a   : > { %p819_p13 = pnand %p818_p12, %p817_p9 }
  0x5b   : > { %p824_p3 = por %p823_p0, %p822_p4 }
  0x5c   : > { %p820_p1 = pneg %p819_p13 }
  0x5d   : > { %p826_p6 = por %p825_p2, %p824_p3 }
  0x5f   : > { %p827_p8 = pnand %p826_p6, %p820_p1 }
  0x61   : > { %830 = shalt.err (!%p827_p8)
}
  0x62   : > { %s831_s21 = scalar_lea.vmem %s1215_s8, 128  ;;  %s978_s18 = smov [#allocation13]  }
  0x63   : > { %p832_p5 = scmp.ne.s32.totalorder %s1215_s8, %s831_s21  ;;  %s836_s20 = sshll.u32 %s978_s18, 4  ;;  %s837_s20 = int_to_ptr.vmem [resolvable:$false] %s836_s20 }
  0x64   : > { %s838_s13 = scalar_lea.vmem %s837_s20, 256  ;;  %p839_p11 = scmp.lt.s32.totalorder %s1215_s8, %s837_s20 }
  0x65   : > { %p834_p9 = pnand %p832_p5, %p818_p12  ;;  %p840_p4 = scmp.lt.s32.totalorder %s838_s13, %s831_s21 }
  0x67   : > { %p835_p13 = pneg %p834_p9  ;;  %p841_p0 = por %p840_p4, %p839_p11 }
  0x69   : > { %p842_p3 = pnand %p841_p0, %p835_p13 }
  0x6b   : > { %845 = shalt.err (!%p842_p3)
}
  0x6c   : > { %644 = dma.hbm_to_vmem [thread:$0]  (!%p1226_p7), %s1220_s29, 128, %s1215_s8, %s159_s3  }
  0x6d   : > { %180 = sbr.rel (%p1166_p10) target bundleno = 1316 (0x524), region = 28  ;;  %s182_s9 = sand.u32 (!%p1166_p10), 1, %s942_s26  }
  0x6e   : > { %s1258_s22 = sshll.u32 (!%p1166_p10), %s182_s9, 3  ;;  %s183_s12 = scalar_lea.sflag (!%p1166_p10), [#allocation11], %s182_s9 }
  0x6f   : > { %s186_s28 = scalar_lea.vmem (!%p1166_p10), [#allocation10], %s1258_s22  ;;  %p1439_p12 = scmp.ne.s32.totalorder (!%p1166_p10), %s1424_s14, 0 }
  0x74   : > { %913 = dma.done.wait (%p1439_p12), %s183_s12, 128  }
  0x75   : > { %915 = vsyncadd (%p1439_p12), %s183_s12, 4294967168  ;;  %s191_s1 = sand.u32 1, %s930_s23   ;;  %p1440_p10 = scmp.ne.s32.totalorder %s1435_s25, 0 }
  0x76   : > { %s1266_s29 = sshll.u32 %s191_s1, 3  ;;  %s192_s8 = scalar_lea.sflag [#allocation14], %s191_s1 }
  0x77   : > { %s195_s10 = scalar_lea.vmem [#allocation13], %s1266_s29 }
  0x78   : > { %917 = dma.done.wait (%p1440_p10), %s192_s8, 128  }
  0x79   : > { %919 = vsyncadd (%p1440_p10), %s192_s8, 4294967168  ;;  %s1441_s3 = sld [smem:[#allocation22_spill]]  ;;  %s1442_s17 = sld [smem:[#allocation21_spill]] }
  0x7a   : > { %s1443_s19 = sld [smem:[#allocation20_spill]]  ;;  %s979_s14 = smov 0.0  }
  0x7f   : > { %p216_p11 = scmp.eq.s32.totalorder %s1441_s3, 0  ;;  %p217_p7 = scmp.eq.s32.totalorder %s1442_s17, 0 }
  0x80   : > { %p220_p2 = scmp.eq.s32.totalorder %s1443_s19, 0  ;;  %p597_p5 = scmp.ne.s32.totalorder %s1443_s19, 0 }
  0x81   : > { %p218_p1 = pnand %p217_p7, %p216_p11  ;;  %vm234_vm0 = vcmask (!%p597_p5), 64512   ;;  %v980_v0 = vmov (!%p597_p5), 0.0  }
  0x82   : > { %235 = vst.msk [vmem:[#allocation2] sm:$0xff] (!%p597_p5), %vm234_vm0, %v980_v0 }
  0x83   : > { %p219_p6 = pneg %p218_p1  ;;  %233 = sbr.rel (%p597_p5) target bundleno = 138 (0x8a), region = 44 }
  0x85   : > { %p221_p8 = pnand %p220_p2, %p219_p6 }
  0x87   : > { %629 = sst [smem:[#allocation7]] (!%p221_p8), %s979_s14 }
  0x88   : > { %630 = sst [smem:[#allocation7 + $0x1]] (!%p221_p8), %s979_s14 }
  0x89   : > { %631 = sst [smem:[#allocation7 + $0x2]] (!%p221_p8), %s979_s14 }
  0x8a PF: > { %p236_p9 = pnand %p220_p2, %p217_p7 }
  0x8b   : > { %vm240_vm1 = vcmask (!%p236_p9), 7168   ;;  %v981_v1 = vmov (!%p236_p9), -inf   ;;  %v982_v2 = vmov (!%p236_p9), 0.0  }
  0x8c   : > { %239 = sbr.rel (%p236_p9) target bundleno = 147 (0x93), region = 48  ;;  %241 = vst.msk [vmem:[#allocation3] sm:$0xff] (!%p236_p9), %vm240_vm1, %v981_v1  ;;  %242 = vst.msk [vmem:[#allocation4] sm:$0xff] (!%p236_p9), %vm240_vm1, %v982_v2 }
  0x93 PF: > { %p243_p13 = pnand %p220_p2, %p216_p11 }
  0x94   : > { %vm248_vm2 = vcmask (!%p243_p13), 57344   ;;  %s1448_s18 = sld [smem:[#allocation21_spill]] (!%p243_p13)  ;;  %v983_v3 = vmov (!%p243_p13), -inf   ;;  %v984_v4 = vmov (!%p243_p13), 0.0  }
  0x95   : > { %246 = sbr.rel (%p243_p13) target bundleno = 156 (0x9c), region = 52 }
  0x9a   : > { %s247_s20 = scalar_lea.vmem (!%p243_p13), [#allocation5], %s1448_s18  ;;  %s250_s13 = scalar_lea.vmem (!%p243_p13), [#allocation6], %s1448_s18 }
  0x9b   : > { %249 = vst.msk [vmem:[%s247_s20] sm:$0x1] (!%p243_p13), %vm248_vm2, %v983_v3  ;;  %251 = vst.msk [vmem:[%s250_s13] sm:$0x1] (!%p243_p13), %vm248_vm2, %v984_v4 }
  0x9c PF: > { %v254_v5 = vld [vmem:[%s195_s10] sm:$0xff]  ;;  %v985_v6 = vmov 0.0   ;;  %vm986_vm3 = vmmov 0   ;;  %v253_v7 = vld [vmem:[%s186_s28] sm:$0xff]  ;;  %vm326_vm4 = vcmask 64512   ;;  %s1449_s9 = sld [smem:[#allocation20_spill]] }
  0x9d   : > { %613 = vmatprep.subr.mxu0 %v985_v6  ;;  %615 = vmatprep.mubr.msk.f32.mxu0 %vm986_vm3, %v985_v6  ;;  %v252_v8 = vld [vmem:[#allocation2] sm:$0xff] }
  0x9e   : > { %614 = vmatpush3.xpose.msra.mxu0 %v254_v5 }
  0xa1   : > { %616 = vmatmul.mubr.f32.vlgmr.msra.gmra.mrb[0].mxu0 %v253_v7 }
  0xa2   : > { %p598_p4 = scmp.ne.s32.totalorder %s1449_s9, 1 }
  0xa3   : > { %s333_s12 = sld [smem:[#allocation9]] (!%p598_p4)  ;;  %s1450_s1 = sld [smem:[#allocation21_spill]] (!%p598_p4)  ;;  %v377_v17 = vlaneseq (!%p598_p4)  ;;  %vm393_vm5 = vcmask (!%p598_p4), 57344   ;;  %v987_v28 = vmov (!%p598_p4), 0   ;;  %v336_v45 = vld [vmem:[#allocation3] sm:$0xff] (!%p598_p4)  ;;  %vm358_vm6 = vcmask (!%p598_p4), 7168  }
  0xa4   : > { %763 = vset.pattern.permute.xlu0 (!%p598_p4), %v987_v28  ;;  %v341_v56 = vld [vmem:[#allocation4] sm:$0xff] (!%p598_p4)  ;;  %s1451_s29 = sld [smem:[#allocation22_spill]] (!%p598_p4) }
  0xa5   : > { %v378_v20 = vshrl.u32 (!%p598_p4), %v377_v17, 7 }
  0xa7   : > { %v379_v24 = vsub.s32 (!%p598_p4), 0, %v378_v20 }
  0xa9   : > { %v334_v13 = vstv (!%p598_p4), %s333_s12  ;;  %s1304_s22 = scalar_lea.vmem (!%p598_p4), [#allocation5], %s1450_s1  ;;  %s1312_s28 = scalar_lea.vmem (!%p598_p4), [#allocation6], %s1450_s1 }
  0xaa   : > { %v362_v23 = vld [vmem:[%s1304_s22] sm:$0x1] (!%p598_p4)  ;;  %p599_p0 = scmp.ne.s32.totalorder (!%p598_p4), %s1451_s29, %s1450_s1 }
  0xab   : > { %v371_v39 = vld [vmem:[%s1312_s28] sm:$0x1] (!%p598_p4) }
 0x171   : > { %331 = sbr.rel (%p598_p4) target bundleno = 1295 (0x50f), region = 56 }
 0x174   : > { %v321_v9 = vpop.f32.mrb[0].mxu0 }
 0x175   : > { %v325_v10 = vadd.f32 %v321_v9, %v252_v8  ;;  %v617_v11 = vpop.f32.mrb[1].mxu0 }
 0x177   : > { %327 = vst.msk [vmem:[#allocation2] sm:$0xff] %vm326_vm4, %v325_v10 }
 0x178   : > { %v403_v60 = vand.u32 (!%p599_p0), 127, %v377_v17  ;;  %s600_s8 = sld [smem:[#allocation7 + $0x2]] (!%p599_p0) }
 0x17a   : > { %vm405_vm7 = vcmp.eq.s32.totalorder (!%p599_p0), %v378_v20, %v403_v60 }
 0x17e   : > { %v332_v12 = vld [vmem:[#allocation2] sm:$0xff] }
 0x17f   : > { %v1299_v14 = vmul.f32 %v334_v13, %v332_v12 }
 0x181   : > { %v337_v15 = vsel %vm326_vm4, %v1299_v14, -inf  ;;  %v406_v61 = vsel (!%p599_p0), %vm405_vm7, %v1299_v14, 0.0 }
 0x182   : > { %338 = vmax.xlane.f32.xlu0 %v337_v15  ;;  %v363_v16 = vrot.slane %v337_v15, 4  ;;  %v407_v62 = vsel (!%p599_p0), %vm326_vm4, %v406_v61, 0.0 }
 0x184   : > { %v364_v18 = vmax.f32 %v337_v15, %v363_v16 }
 0x186   : > { %v365_v19 = vrot.slane %v364_v18, 2 }
 0x188   : > { %v366_v21 = vmax.f32 %v364_v18, %v365_v19 }
 0x18a   : > { %v367_v22 = vrot.slane %v366_v21, 1 }
 0x18c   : > { %v368_v25 = vmax.f32 %v366_v21, %v367_v22 }
 0x18e   : > { %v369_v26 = vmax.f32 %v362_v23, %v368_v25 }
 0x190   : > { %v380_v27 = vrot.slane %v369_v26, %v379_v24  ;;  %395 = vst.msk [vmem:[%s1304_s22] sm:$0x1] %vm393_vm5, %v369_v26  ;;  %v372_v31 = vsub.f32 %v362_v23, %v369_v26 }
 0x192   : > { %v382_v29 = vsub.f32 %v1299_v14, %v380_v27  ;;  %v373_v32 = vmul.f32 1.442695, %v372_v31 }
 0x194   : > { %v383_v30 = vmul.f32 1.442695, %v382_v29 }
 0x196   : > { %764 = vpow2.f32 %v383_v30 }
 0x197   : > { %766 = vpow2.f32 %v373_v32 }
 0x1a0   : > { %v765_v33 = vpop.eup %764 }
 0x1a1   : > { %v385_v34 = vsel %vm326_vm4, %v765_v33, 0.0  ;;  %v767_v38 = vpop.eup %766 }
 0x1a2   : > { %v386_v35 = vrot.slane %v385_v34, 4  ;;  %v375_v41 = vmul.f32 %v767_v38, %v371_v39 }
 0x1a4   : > { %v387_v36 = vadd.f32 %v386_v35, %v385_v34 }
 0x1a6   : > { %v388_v37 = vrot.slane %v387_v36, 2 }
 0x1a8   : > { %v389_v40 = vadd.f32 %v388_v37, %v387_v36 }
 0x1aa   : > { %v390_v42 = vrot.slane %v389_v40, 1 }
 0x1ac   : > { %v391_v43 = vadd.f32 %v390_v42, %v389_v40 }
 0x1ae   : > { %v392_v44 = vadd.f32 %v391_v43, %v375_v41 }
 0x1b0   : > { %394 = vst.msk [vmem:[%s1312_s28] sm:$0x1] %vm393_vm5, %v392_v44 }
 0x20f   : > { %v339_v46 = vpop.xlane.xlu0 %338 }
 0x210   : > { %v340_v47 = vmax.f32 %v336_v45, %v339_v46 }
 0x212   : > { %v342_v48 = vsub.f32 %v336_v45, %v340_v47  ;;  %360 = vst.msk [vmem:[#allocation3] sm:$0xff] %vm358_vm6, %v340_v47  ;;  %348 = vperm.xlu0 %763, %v340_v47  }
 0x214   : > { %v343_v54 = vmul.f32 1.442695, %v342_v48 }
 0x231   : > { %408 = vadd.xlane.f32.xlu0 (!%p599_p0), %v407_v62 }
 0x291   : > { %v349_v49 = vpop.permute.xlu0 %348 }
 0x292   : > { %v351_v50 = vsub.f32 %v1299_v14, %v349_v49 }
 0x294   : > { %v352_v51 = vmul.f32 1.442695, %v351_v50 }
 0x296   : > { %768 = vpow2.f32 %v352_v51 }
 0x297   : > { %770 = vpow2.f32 %v343_v54 }
 0x2a0   : > { %v769_v52 = vpop.eup %768 }
 0x2a1   : > { %v354_v53 = vsel %vm326_vm4, %v769_v52, 0.0  ;;  %v771_v55 = vpop.eup %770 }
 0x2a2   : > { %355 = vadd.xlane.f32.xlu1 %v354_v53  ;;  %v345_v57 = vmul.f32 %v771_v55, %v341_v56 }
 0x2be   : > { %v409_v63 = vpop.xlane.xlu0 (!%p599_p0), %408 }
 0x2bf   : > { %v410_v0 = vrot.slane (!%p599_p0), %v409_v63, 4 }
 0x2c1   : > { %v411_v1 = vadd.f32 (!%p599_p0), %v410_v0, %v409_v63 }
 0x2c3   : > { %v412_v2 = vrot.slane (!%p599_p0), %v411_v1, 2 }
 0x2c5   : > { %v413_v3 = vadd.f32 (!%p599_p0), %v412_v2, %v411_v1 }
 0x2c7   : > { %v414_v4 = vrot.slane (!%p599_p0), %v413_v3, 1 }
 0x2c9   : > { %v415_v5 = vadd.f32 (!%p599_p0), %v414_v4, %v413_v3 }
 0x2cb   : > { %618 = vpush (!%p599_p0), %v415_v5 }
 0x2fc   : > { %s619_s10 = spop (!%p599_p0), %618 }
 0x2fd   : > { %s417_s3 = sadd.f32 (!%p599_p0), %s619_s10, %s600_s8 }
 0x2ff   : > { %419 = sst [smem:[#allocation7 + $0x2]] (!%p599_p0), %s417_s3 }
 0x32c   : > { %399 = sbr.rel (%p599_p0) target bundleno = 819 (0x333), region = 60 }
 0x32f   : > { %v356_v58 = vpop.xlane.xlu1 %355 }
 0x330   : > { %v357_v59 = vadd.f32 %v356_v58, %v345_v57 }
 0x332   : > { %359 = vst.msk [vmem:[#allocation4] sm:$0xff] %vm358_vm6, %v357_v59 }
 0x333 PF: > { %s1452_s17 = sld [smem:[#allocation21_spill]] }
 0x339   : > { %p420_p3 = scmp.eq.s32.totalorder %s1452_s17, 1  ;;  %p601_p12 = scmp.ne.s32.totalorder %s1452_s17, 1 }
 0x33a   : > { %v426_v6 = vld [vmem:[#allocation4] sm:$0xff] (!%p601_p12)  ;;  %v425_v8 = vld [vmem:[#allocation3] sm:$0xff] (!%p601_p12)  ;;  %s424_s19 = sld [smem:[#allocation7]] (!%p601_p12) }
 0x33b   : > { %423 = sbr.rel (%p601_p12) target bundleno = 1050 (0x41a), region = 64  ;;  %772 = vlog2.f32 (!%p601_p12), %v426_v6 }
 0x345   : > { %v773_v7 = vpop.eup %772 }
 0x346   : > { %v428_v9 = vmul.f32 0.6931472, %v773_v7 }
 0x348   : > { %v429_v10 = vadd.f32 %v428_v9, %v425_v8 }
 0x34a   : > { %v430_v11 = vsel %vm358_vm6, %v429_v10, 0.0 }
 0x34b   : > { %431 = vadd.xlane.f32.xlu0 %v430_v11 }
 0x3d8   : > { %v432_v12 = vpop.xlane.xlu0 %431 }
 0x3d9   : > { %v433_v13 = vrot.slane %v432_v12, 4 }
 0x3db   : > { %v434_v14 = vadd.f32 %v433_v13, %v432_v12 }
 0x3dd   : > { %v435_v15 = vrot.slane %v434_v14, 2 }
 0x3df   : > { %v436_v16 = vadd.f32 %v435_v15, %v434_v14 }
 0x3e1   : > { %v437_v17 = vrot.slane %v436_v16, 1 }
 0x3e3   : > { %v438_v18 = vadd.f32 %v437_v17, %v436_v16 }
 0x3e5   : > { %620 = vpush %v438_v18 }
 0x416   : > { %s621_s14 = spop %620 }
 0x417   : > { %s440_s25 = sadd.f32 %s621_s14, %s424_s19 }
 0x419   : > { %442 = sst [smem:[#allocation7]] %s440_s25 }
 0x41a PF: > { %s1453_s11 = sld [smem:[#allocation22_spill]] }
 0x420   : > { %p443_p10 = scmp.eq.s32.totalorder %s1453_s11, 1  ;;  %p602_p11 = scmp.ne.s32.totalorder %s1453_s11, 1 }
 0x421   : > { %v449_v19 = vld [vmem:[%s1312_s28] sm:$0x1] (!%p602_p11)  ;;  %s603_s7 = sld [smem:[#allocation7 + $0x1]] (!%p602_p11) }
 0x422   : > { %446 = sbr.rel (%p602_p11) target bundleno = 1281 (0x501), region = 68  ;;  %774 = vlog2.f32 (!%p602_p11), %v449_v19  ;;  %v448_v21 = vld [vmem:[%s1304_s22] sm:$0x1] (!%p602_p11) }
 0x42c   : > { %v775_v20 = vpop.eup %774 }
 0x42d   : > { %v451_v22 = vmul.f32 0.6931472, %v775_v20 }
 0x42f   : > { %v452_v23 = vadd.f32 %v451_v22, %v448_v21 }
 0x431   : > { %v453_v24 = vsel %vm393_vm5, %v452_v23, 0.0 }
 0x432   : > { %454 = vadd.xlane.f32.xlu0 %v453_v24 }
 0x4bf   : > { %v455_v25 = vpop.xlane.xlu0 %454 }
 0x4c0   : > { %v456_v26 = vrot.slane %v455_v25, 4 }
 0x4c2   : > { %v457_v27 = vadd.f32 %v456_v26, %v455_v25 }
 0x4c4   : > { %v458_v28 = vrot.slane %v457_v27, 2 }
 0x4c6   : > { %v459_v29 = vadd.f32 %v458_v28, %v457_v27 }
 0x4c8   : > { %v460_v30 = vrot.slane %v459_v29, 1 }
 0x4ca   : > { %v461_v31 = vadd.f32 %v460_v30, %v459_v29 }
 0x4cc   : > { %622 = vpush %v461_v31 }
 0x4fd   : > { %s623_s21 = spop %622 }
 0x4fe   : > { %s463_s18 = sadd.f32 %s623_s21, %s603_s7 }
 0x500   : > { %465 = sst [smem:[#allocation7 + $0x1]] %s463_s18 }
 0x501 PF: > { %p466_p7 = pnand %p443_p10, %p420_p3  ;;  %s471_s9 = sld [smem:[#allocation7]] }
 0x502   : > { %s605_s12 = sld [smem:[#allocation7 + $0x1]]  ;;  %s606_s1 = sld [smem:[#allocation7 + $0x2]] }
 0x503   : > { %s604_s22 = sld [smem:[#allocation9 + $0x1]] }
 0x508   : > { %s473_s28 = sadd.f32 %s605_s12, %s471_s9  ;;  %s475_s29 = smul.f32 2.0, %s606_s1 }
 0x50a   : > { %s476_s8 = ssub.f32 %s473_s28, %s475_s29 }
 0x50c   : > { %s477_s10 = smul.f32 %s604_s22, %s476_s8 }
 0x50e   : > { %633 = sst [smem:[#allocation15]] (!%p466_p7), %s477_s10 }
 0x50f PF: > { %s1456_s3 = sadd.s32 4294967295, %s974_s6   ;;  %s1457_s14 = sld [smem:[#allocation26_spill]] }
 0x510   : > { %p646_p1 = scmp.eq.s32.totalorder %s1456_s3, 7 }
 0x515   : > { %s846_s25 = scalar_lea.hbm %s1457_s14, 16 }
 0x516   : > { %p847_p2 = scmp.ne.s32.totalorder %s1457_s14, %s846_s25  ;;  %p852_p5 = scmp.lt.u32.totalorder %s846_s25, %s1457_s14 }
 0x518   : > { %p848_p6 = pnand %p847_p2, %p646_p1 }
 0x51a   : > { %p849_p8 = pneg %p848_p6 }
 0x51c   : > { %p854_p9 = pnand %p852_p5, %p849_p8 }
 0x51e   : > { %857 = shalt.err (!%p854_p9)
}
 0x51f   : > { %s988_s20 = smov [#allocation15]  }
 0x520   : > { %635 = dma.smem_to_hbm (%p646_p1), %s988_s20, 16, %s1457_s14, [#allocation12]  }
 0x521   : > { %921 = dma.done.wait (%p646_p1), [#allocation12], 16  }
 0x522   : > { %923 = vsyncadd (%p646_p1), [#allocation12], 4294967280 }
 0x523   : > { %493 = sfence }
 0x524 PF: > { %s24_s6 = sadd.s32 1, %s974_s6   ;;  %s1459_s1 = sld [smem:[#allocation23_spill]] }
 0x525   : > { %p1352_p13 = scmp.ge.s32.totalorder %s24_s6, 10   ;;  %s1460_s8 = sld [smem:[#allocation24_spill]] }
 0x526   : > { %s1461_s22 = smov %s930_s23  ;;  %s1462_s23 = smov %s934_s24 }
 0x527   : > { %s1463_s24 = smov %s1203_s15  ;;  %s1464_s25 = smov %s942_s26 }
 0x528   : > { %s1465_s26 = smov %s946_s27  ;;  %s1466_s27 = smov %s1213_s0 }
 0x529   : > { %s1467_s0 = smov %s962_s30  ;;  %s1468_s28 = smov %s966_s4 }
 0x52a   : > { %s1469_s29 = smov %s970_s5  ;;  %s1470_s30 = smov %s1459_s1 }
 0x52b   : > { %s1471_s4 = smov %s1460_s8  ;;  %s1472_s5 = smov %s1482_s16 }
 0x52c   :  { %23 = sbr.rel (!%p1352_p13) target bundleno = 24 (0x18), region = 125 }
 0x533   :  { %499 = vsyncpa [#allocation11], 1 }
 0x534   :  { %501 = vsyncpa [#allocation11 + $0x1], 1 }
 0x535   :  { %502 = vsyncpa [#allocation14], 1 }
 0x536   :  { %504 = vsyncpa [#allocation14 + $0x1], 1 }
 0x537   :  { %505 = vsyncpa [#allocation12], 1 }
 0x538   :  { %507 = vsyncpa [#allocation12 + $0x1], 1 }

</bundles_post_ra>
